<compile_context>
chip_gen: v5e
topology: v5e:2x2
jax: 0.10.0
libtpu: 0.0.40
codegen_flags: <defaults>
</compile_context>

<pallas_src>
import jax
import jax.numpy as jnp
from jax.experimental import pallas as pl
from jax.experimental.pallas import tpu as pltpu

N_FEATURES = 2
N_OUT = 1
LANE = 128
TILE = 512  # lanes per grid step (multiple of 128); shrunk to n_pad if smaller


def linear_kernel(x_ref, w_ref, b_ref, o_ref):
    # x_ref: (2, tile) f32 in VMEM (features on sublanes, batch on lanes)
    # w_ref: (2,) f32 in SMEM, b_ref: (1,) f32 in SMEM
    # o_ref: (1, tile) f32 in VMEM
    w0 = w_ref[0]
    w1 = w_ref[1]
    b = b_ref[0]
    # Pure VPU: two scalar*vector FMAs + bias broadcast, one dense lane store.
    o_ref[...] = w0 * x_ref[0:1, :] + w1 * x_ref[1:2, :] + b


@jax.jit
def linear_regression_forward(x, weight, bias):
    """x: [N, 2] f32; weight: [1, 2] f32 (torch layout); bias: [1] f32.

    Returns [N, 1] f32, identical semantics to nn.Linear(2, 1): x @ weight.T + bias.
    """
    n = x.shape[0]
    n_pad = pl.cdiv(n, LANE) * LANE          # round batch up to full lanes
    tile = min(TILE, n_pad)
    grid = (n_pad // tile,)

    # Layout plumbing (not compute): lane-dense transposed input, zero-padded.
    x_t = jnp.pad(x.astype(jnp.float32), ((0, n_pad - n), (0, 0))).T  # (2, n_pad)

    w = weight.reshape(-1).astype(jnp.float32)   # (2,)  scalars in SMEM
    b = bias.reshape(-1).astype(jnp.float32)     # (1,)  scalar in SMEM

    out_t = pl.pallas_call(
        linear_kernel,
        out_shape=jax.ShapeDtypeStruct((N_OUT, n_pad), jnp.float32),
        grid=grid,
        in_specs=[
            pl.BlockSpec((N_FEATURES, tile), lambda i: (0, i)),        # x tile
            pl.BlockSpec(memory_space=pltpu.MemorySpace.SMEM),         # weight scalars
            pl.BlockSpec(memory_space=pltpu.MemorySpace.SMEM),         # bias scalar
        ],
        out_specs=pl.BlockSpec((N_OUT, tile), lambda i: (0, i)),
        compiler_params=pltpu.CompilerParams(
            dimension_semantics=("parallel",)),
    )(x_t, w, b)

    # Back to the PyTorch output layout [N, 1].
    return out_t[:, :n].T


if __name__ == "__main__":
    key = jax.random.PRNGKey(0)
    # Same shape as the PyTorch script: x = torch.rand([50, 2])
    x = jax.random.uniform(key, (50, 2), dtype=jnp.float32)

    # Deterministic parameter init matching the module's __init__:
    #   linear.weight.data.fill_(1)  -> weight shape (1, 2), all ones
    #   linear.bias.data.fill_(10)   -> bias shape (1,), all tens
    weight = jnp.ones((N_OUT, N_FEATURES), dtype=jnp.float32)
    bias = jnp.full((N_OUT,), 10.0, dtype=jnp.float32)

    out = linear_regression_forward(x, weight, bias)
    out = jax.block_until_ready(out)

    # Reference check (plain JAX) to make sure semantics match nn.Linear.
    ref = x @ weight.T + bias
    assert out.shape == (50, 1)
    assert jnp.allclose(out, ref, atol=1e-5), "mismatch vs reference"

    print("KERNEL_OK")
</pallas_src>

<mosaic_0001>
module attributes {stable_mosaic.version = 11 : i64} {
  func.func @linear_kernel(%arg0: i32, %arg1: memref<2x128xf32, #tpu.memory_space<vmem>>, %arg2: memref<2xf32, #tpu.memory_space<smem>>, %arg3: memref<1xf32, #tpu.memory_space<smem>>, %arg4: memref<1x128xf32, #tpu.memory_space<vmem>>) attributes {dimension_semantics = [#tpu.dimension_semantics<parallel>], iteration_bounds = array<i64: 1>, scalar_prefetch = 0 : i64, scratch_operands = 0 : i64, tpu.core_type = #tpu.core_type<tc>, window_params = [{transform_indices = @transform_0, window_bounds = array<i64: 2, 128>}, {transform_indices = @transform_1, window_bounds = array<i64: 2>}, {transform_indices = @transform_2, window_bounds = array<i64: 1>}, {transform_indices = @transform_3, window_bounds = array<i64: 1, 128>}]} {
    %c0 = arith.constant 0 : index
    %0 = memref.load %arg2[%c0] : memref<2xf32, #tpu.memory_space<smem>>
    %c1 = arith.constant 1 : index
    %1 = memref.load %arg2[%c1] : memref<2xf32, #tpu.memory_space<smem>>
    %c0_0 = arith.constant 0 : index
    %2 = memref.load %arg3[%c0_0] : memref<1xf32, #tpu.memory_space<smem>>
    %c0_1 = arith.constant 0 : index
    %c0_2 = arith.constant 0 : index
    %3 = vector.load %arg1[%c0_1, %c0_2] : memref<2x128xf32, #tpu.memory_space<vmem>>, vector<1x128xf32>
    %4 = vector.broadcast %0 : f32 to vector<1x128xf32>
    %5 = arith.mulf %4, %3 : vector<1x128xf32>
    %c1_3 = arith.constant 1 : index
    %c0_4 = arith.constant 0 : index
    %6 = vector.load %arg1[%c1_3, %c0_4] : memref<2x128xf32, #tpu.memory_space<vmem>>, vector<1x128xf32>
    %7 = vector.broadcast %1 : f32 to vector<1x128xf32>
    %8 = arith.mulf %7, %6 : vector<1x128xf32>
    %9 = arith.addf %5, %8 : vector<1x128xf32>
    %10 = vector.broadcast %2 : f32 to vector<1x128xf32>
    %11 = arith.addf %9, %10 : vector<1x128xf32>
    %c0_5 = arith.constant 0 : index
    %c0_6 = arith.constant 0 : index
    %12 = vector.load %arg4[%c0_5, %c0_6] : memref<1x128xf32, #tpu.memory_space<vmem>>, vector<1x128xf32>
    tpu.vector_store %arg4[%c0_5, %c0_6], %11 {strides = array<i32>} : memref<1x128xf32, #tpu.memory_space<vmem>>, vector<1x128xf32>,
    return
  }
  func.func @transform_0(%arg0: i32) -> (i32, i32) {
    %c0_i32 = arith.constant 0 : i32
    %c0_i32_0 = arith.constant 0 : i32
    return %c0_i32, %arg0 : i32, i32
  }
  func.func @transform_1(%arg0: i32) -> i32 {
    %c0_i32 = arith.constant 0 : i32
    %c0_i32_0 = arith.constant 0 : i32
    return %c0_i32 : i32
  }
  func.func @transform_2(%arg0: i32) -> i32 {
    %c0_i32 = arith.constant 0 : i32
    %c0_i32_0 = arith.constant 0 : i32
    return %c0_i32 : i32
  }
  func.func @transform_3(%arg0: i32) -> (i32, i32) {
    %c0_i32 = arith.constant 0 : i32
    %c0_i32_0 = arith.constant 0 : i32
    return %c0_i32, %arg0 : i32, i32
  }
}

</mosaic_0001>

<bundles_post_ra>
// kernel: linear_regression_forward.1
= control target key start
LH: loop header
LB: loop body
LE: loop exit
PB: predicated region body
PF: predicated region fallthrough
CT: control target
= control target key end

     0   :  { %9 = vsyncpa [#allocation4], 0  ;;  %s62_s15 = smov [#allocation3]   ;;  %s98_s0 = inlined_call_operand.vmem [shape: f32[2,128], index: 0, kind: input, shape index: {}]   ;;  %s99_s1 = inlined_call_operand.vmem [shape: f32[2], index: 1, kind: input, shape index: {}]   ;;  %s100_s2 = inlined_call_operand.<no memory space> [shape: f32[1], index: 2, kind: input, shape index: {}]   ;;  %s101_s3 = inlined_call_operand.vmem [shape: f32[1,128], index: 3, kind: output, shape index: {}]  }
   0x1   :  { %s17_s14 = sshll.u32 %s99_s1, 4  ;;  %s18_s14 = int_to_ptr.vmem [resolvable:$true] %s17_s14 }
   0x2   :  { %20 = dma.vmem_to_smem %s18_s14, 16, %s62_s15, [#allocation4]  }
   0x3   :  { %60 = dma.done.wait [#allocation4], 16  }
   0x4   :  { %61 = vsyncadd [#allocation4], 4294967280 }
   0x5   :  { %27 = sfence }
   0x6   :  { %s28_s16 = sld [smem:[#allocation3]]  ;;  %v31_v0 = vld [vmem:[%s98_s0] sm:$0x1]  ;;  %v34_v1 = vld [vmem:[%s98_s0 + $0x1] sm:$0x1]  ;;  %v38_v6 = vstv %s100_s2 }
   0x7   :  { %s46_s17 = sld [smem:[#allocation3 + $0x1]] }
   0xc   :  { %v32_v2 = vstv %s28_s16 }
   0xd   :  { %v33_v3 = vmul.f32 %v32_v2, %v31_v0  ;;  %v35_v4 = vstv %s46_s17 }
   0xe   :  { %v36_v5 = vmul.f32 %v35_v4, %v34_v1 }
  0x10   :  { %v37_v7 = vadd.f32 %v36_v5, %v33_v3 }
  0x12   :  { %v39_v8 = vadd.f32 %v38_v6, %v37_v7 }
  0x14   :  { %40 = vst [vmem:[%s101_s3] sm:$0x1] %v39_v8 }
  0x15   :  { %45 = vsyncpa [#allocation4], 1 }

</bundles_post_ra>
